<compile_context>
chip_gen: v7x
topology: tpu7x:2x2x1
jax: 0.10.0
libtpu: 0.0.40
codegen_flags: <defaults>
</compile_context>

<pallas_src>
import functools

import jax
import jax.numpy as jnp
from jax.experimental import pallas as pl
from jax.experimental.pallas import tpu as pltpu


def _round_up(x, m):
    return (x + m - 1) // m * m


def _focal_tile_kernel(x_ref, t_ref, w_ref, o_ref, acc_ref, *,
                       gamma, nc, hw, tm, tl):
    i = pl.program_id(0)          # row-tile index ("parallel")
    j = pl.program_id(1)          # lane-tile index (reduction, "arbitrary")
    ni = pl.num_programs(0)
    nj = pl.num_programs(1)

    @pl.when(j == 0)
    def _():
        acc_ref[...] = jnp.zeros_like(acc_ref)

    def body(mask_rows, mask_cols):
        x = x_ref[...].astype(jnp.float32)   # (tm, tl) logits
        t = t_ref[...].astype(jnp.float32)   # (tm, tl) targets
        w = w_ref[...].astype(jnp.float32)   # (tm, 1)  per-row pos_weight

        # Numerically-stable BCE-with-logits with pos_weight (matches PyTorch):
        #   bce = (1 - t) * x + (1 + (w - 1) * t) * softplus(-x)
        #   softplus(-x) = log1p(exp(-|x|)) + max(-x, 0)
        softplus_neg_x = jnp.log1p(jnp.exp(-jnp.abs(x))) + jnp.maximum(-x, 0.0)
        bce = (1.0 - t) * x + (1.0 + (w - 1.0) * t) * softplus_neg_x

        logpt = -bce
        pt = jnp.exp(logpt)
        om_pt = 1.0 - pt

        # Integer-gamma specialization: repeated VPU multiplies instead of pow
        # (pow -> exp(gamma*log(.)) would hit the single EUP slot twice more).
        g = float(gamma)
        if g == int(g) and 0 <= int(g) <= 8:
            mod = jnp.ones_like(om_pt)
            for _ in range(int(g)):
                mod = mod * om_pt
        else:
            mod = om_pt ** g
        focal = -mod * logpt                 # (tm, tl)

        # Select-based masking (NOT multiplicative) so garbage/NaN/inf from
        # out-of-bounds tail data never pollutes the accumulator.
        if mask_rows:
            rows = jax.lax.broadcasted_iota(jnp.int32, (tm, 1), 0) + i * tm
            focal = jnp.where(rows < nc, focal, 0.0)
        if mask_cols:
            cols = jax.lax.broadcasted_iota(jnp.int32, (1, tl), 1) + j * tl
            focal = jnp.where(cols < hw, focal, 0.0)

        # Fold rows into the wide (8, tl) accumulator: each add spans tl//128
        # independent vregs (ILP), no per-step cross-lane XLU reduce, no masked
        # scalar stores.
        acc = acc_ref[...]
        for r in range(tm // 8):
            acc = acc + focal[r * 8:(r + 1) * 8, :]
        acc_ref[...] = acc

    # Gate tail masking so only edge tiles pay for it.
    row_tail = (nc % tm) != 0
    col_tail = (hw % tl) != 0
    if not row_tail and not col_tail:
        body(False, False)
    elif row_tail and not col_tail:
        pl.when(i != ni - 1)(lambda: body(False, False))
        pl.when(i == ni - 1)(lambda: body(True, False))
    elif col_tail and not row_tail:
        pl.when(j != nj - 1)(lambda: body(False, False))
        pl.when(j == nj - 1)(lambda: body(False, True))
    else:
        pl.when((i != ni - 1) & (j != nj - 1))(lambda: body(False, False))
        pl.when((i == ni - 1) & (j != nj - 1))(lambda: body(True, False))
        pl.when((i != ni - 1) & (j == nj - 1))(lambda: body(False, True))
        pl.when((i == ni - 1) & (j == nj - 1))(lambda: body(True, True))

    # Collapse lanes to a single (8,128) block once per row-tile, at the last
    # reduction step, and emit the lane-dense partial-sum block.
    @pl.when(j == nj - 1)
    def _():
        acc = acc_ref[...]
        out = acc[:, 0:128]
        for c in range(1, tl // 128):
            out = out + acc[:, c * 128:(c + 1) * 128]
        o_ref[...] = out


def focal_loss_2d(output, target, weight, *, gamma=2.0, balance_param=0.25,
                  tile_rows=None, tile_lanes=None):
    """output, target: (N, C, H, W); weight: (C,) pos_weight. Returns scalar f32."""
    assert output.shape == target.shape
    N, C, H, W = output.shape
    NC, HW = N * C, H * W
    n_elem = NC * HW

    # Lane-dense 2D slabs; keep the producer dtype (bf16 halves HBM traffic,
    # the kernel casts to f32 internally).
    x2d = output.reshape(NC, HW)
    t2d = target.reshape(NC, HW)
    w_col = jnp.broadcast_to(weight.astype(jnp.float32).reshape(1, C),
                             (N, C)).reshape(NC, 1)

    itemsize = max(jnp.dtype(output.dtype).itemsize,
                   jnp.dtype(target.dtype).itemsize)

    # Row tiles: aim for >=4 tiles along the "parallel" axis (so v7x's two
    # TensorCores both get work), capped at 256 rows.
    TM = max(8, min(256, _round_up(-(-NC // 4), 8)))
    TM = min(TM, _round_up(NC, 8))
    if tile_rows is not None:
        TM = min(_round_up(tile_rows, 8), _round_up(NC, 8))

    # Lane tiles: biggest tile such that one input tile is ~<=4 MiB, i.e. the two
    # double-buffered inputs stream ~16 MiB of VMEM (fits v7x's 64 MiB VMEM and,
    # with the explicit vmem_limit below, v5e/v6e as well).
    tile_budget = 4 * 1024 * 1024
    tl_cap = max(128, (tile_budget // (TM * itemsize)) // 128 * 128)
    tl_cap = min(tl_cap, 8192)
    TL = min(_round_up(HW, 128), tl_cap)
    if tile_lanes is not None:
        TL = min(_round_up(tile_lanes, 128), _round_up(HW, 128))

    n_row_tiles = -(-NC // TM)
    n_col_tiles = -(-HW // TL)
    grid = (n_row_tiles, n_col_tiles)

    # Scoped-VMEM limit sized from actual usage (with headroom), clamped to what
    # every generation tolerates (<= 64 MiB, v7x physical VMEM).
    usage = (2 * 2 * TM * TL * itemsize      # x, t double-buffered
             + 2 * TM * 128 * 4              # weight column (lane-padded)
             + 8 * TL * 4                    # wide accumulator scratch
             + 2 * 8 * 128 * 4)              # output block double-buffered
    vmem_limit = int(min(64 << 20, max(32 << 20, usage * 2)))

    kernel = functools.partial(
        _focal_tile_kernel,
        gamma=float(gamma), nc=NC, hw=HW, tm=TM, tl=TL,
    )

    partials = pl.pallas_call(
        kernel,
        out_shape=jax.ShapeDtypeStruct((n_row_tiles * 8, 128), jnp.float32),
        grid=grid,
        in_specs=[
            pl.BlockSpec((TM, TL), lambda i, j: (i, j)),   # logits
            pl.BlockSpec((TM, TL), lambda i, j: (i, j)),   # targets
            pl.BlockSpec((TM, 1), lambda i, j: (i, 0)),    # per-row pos_weight
        ],
        out_specs=pl.BlockSpec((8, 128), lambda i, j: (i, 0)),
        scratch_shapes=[pltpu.VMEM((8, TL), jnp.float32)],
        compiler_params=pltpu.CompilerParams(
            dimension_semantics=("parallel", "arbitrary"),
            vmem_limit_bytes=vmem_limit,
        ),
    )(x2d, t2d, w_col)

    # Tiny epilogue in plain JAX: global sum of partials, mean, balance scaling.
    total = jnp.sum(partials)
    return (balance_param * total / jnp.float32(n_elem)).astype(jnp.float32)


def _focal_loss_2d_ref(output, target, weight, *, gamma=2.0, balance_param=0.25):
    # Pure-JAX reference for sanity checking.
    x = output.astype(jnp.float32)
    t = target.astype(jnp.float32)
    w = weight.astype(jnp.float32)[None, :, None, None]
    sp_neg = jnp.log1p(jnp.exp(-jnp.abs(x))) + jnp.maximum(-x, 0.0)
    bce = (1.0 - t) * x + (1.0 + (w - 1.0) * t) * sp_neg
    logpt = -bce
    pt = jnp.exp(logpt)
    fl = -((1.0 - pt) ** gamma) * logpt
    return balance_param * jnp.mean(fl)


if __name__ == "__main__":
    key = jax.random.PRNGKey(0)

    # Test 1: aligned shapes, default (large-tile) config — no masking path.
    k1, k2 = jax.random.split(key)
    N, C, H, W = 2, 4, 16, 16
    output = jax.random.normal(k1, (N, C, H, W), dtype=jnp.float32)
    target = jax.random.bernoulli(k2, 0.5, (N, C, H, W)).astype(jnp.float32)
    weight = jnp.linspace(0.5, 2.0, C, dtype=jnp.float32)

    loss = focal_loss_2d(output, target, weight, gamma=2.0, balance_param=0.25)
    loss = jax.block_until_ready(loss)
    ref = _focal_loss_2d_ref(output, target, weight, gamma=2.0, balance_param=0.25)
    assert jnp.allclose(loss, ref, rtol=1e-5, atol=1e-6), (loss, ref)

    # Test 2: unaligned shapes (row + lane tails, single row-tile) — exercises the
    # no-pad tail path with gated select masking and multi-step lane reduction.
    k3, k4 = jax.random.split(jax.random.PRNGKey(1))
    N2, C2, H2, W2 = 2, 3, 15, 17
    output2 = jax.random.normal(k3, (N2, C2, H2, W2), dtype=jnp.float32)
    target2 = jax.random.bernoulli(k4, 0.5, (N2, C2, H2, W2)).astype(jnp.float32)
    weight2 = jnp.linspace(0.5, 2.0, C2, dtype=jnp.float32)

    loss2 = focal_loss_2d(output2, target2, weight2, gamma=2.0,
                          balance_param=0.25, tile_rows=8, tile_lanes=128)
    loss2 = jax.block_until_ready(loss2)
    ref2 = _focal_loss_2d_ref(output2, target2, weight2, gamma=2.0, balance_param=0.25)
    assert jnp.allclose(loss2, ref2, rtol=1e-5, atol=1e-6), (loss2, ref2)

    # Test 3: multiple row-tiles AND lane-tiles with tails in both dims —
    # exercises the 4-way mask gating and the resident wide accumulator.
    k5, k6 = jax.random.split(jax.random.PRNGKey(2))
    N3, C3, H3, W3 = 2, 5, 15, 20
    output3 = jax.random.normal(k5, (N3, C3, H3, W3), dtype=jnp.float32)
    target3 = jax.random.bernoulli(k6, 0.5, (N3, C3, H3, W3)).astype(jnp.float32)
    weight3 = jnp.linspace(0.5, 2.0, C3, dtype=jnp.float32)

    loss3 = focal_loss_2d(output3, target3, weight3, gamma=2.0,
                          balance_param=0.25, tile_rows=8, tile_lanes=128)
    loss3 = jax.block_until_ready(loss3)
    ref3 = _focal_loss_2d_ref(output3, target3, weight3, gamma=2.0, balance_param=0.25)
    assert jnp.allclose(loss3, ref3, rtol=1e-5, atol=1e-6), (loss3, ref3)

    print("KERNEL_OK")
</pallas_src>

<mosaic_0001>
module attributes {stable_mosaic.version = 11 : i64} {
  func.func @_focal_tile_kernel(%arg0: i32, %arg1: i32, %arg2: memref<8x256xf32, #tpu.memory_space<vmem>>, %arg3: memref<8x256xf32, #tpu.memory_space<vmem>>, %arg4: memref<8x1xf32, #tpu.memory_space<vmem>>, %arg5: memref<8x128xf32, #tpu.memory_space<vmem>>, %arg6: memref<8x256xf32, #tpu.memory_space<vmem>>) attributes {dimension_semantics = [#tpu.dimension_semantics<parallel>, #tpu.dimension_semantics<arbitrary>], iteration_bounds = array<i64: 1, 1>, scalar_prefetch = 0 : i64, scratch_operands = 1 : i64, tpu.core_type = #tpu.core_type<tc>, window_params = [{transform_indices = @transform_0, window_bounds = array<i64: 8, 256>}, {transform_indices = @transform_1, window_bounds = array<i64: 8, 256>}, {transform_indices = @transform_2, window_bounds = array<i64: 8, 1>}, {transform_indices = @transform_3, window_bounds = array<i64: 8, 128>}]} {
    %c0_i32 = arith.constant 0 : i32
    %0 = arith.cmpi eq, %arg1, %c0_i32 : i32
    %1 = arith.extui %0 : i1 to i32
    %c0_i32_0 = arith.constant 0 : i32
    %2 = arith.cmpi ne, %1, %c0_i32_0 : i32
    scf.if %2 {
      %cst_21 = arith.constant 0.000000e+00 : f32
      %44 = vector.broadcast %cst_21 : f32 to vector<8x256xf32>
      %c0_22 = arith.constant 0 : index
      %c0_23 = arith.constant 0 : index
      %45 = vector.load %arg6[%c0_22, %c0_23] : memref<8x256xf32, #tpu.memory_space<vmem>>, vector<8x256xf32>
      tpu.vector_store %arg6[%c0_22, %c0_23], %44 {strides = array<i32>} : memref<8x256xf32, #tpu.memory_space<vmem>>, vector<8x256xf32>,
    } else {
    }
    %c0 = arith.constant 0 : index
    %c0_1 = arith.constant 0 : index
    %3 = vector.load %arg2[%c0, %c0_1] : memref<8x256xf32, #tpu.memory_space<vmem>>, vector<8x256xf32>
    %c0_2 = arith.constant 0 : index
    %c0_3 = arith.constant 0 : index
    %4 = vector.load %arg3[%c0_2, %c0_3] : memref<8x256xf32, #tpu.memory_space<vmem>>, vector<8x256xf32>
    %c0_4 = arith.constant 0 : index
    %c0_5 = arith.constant 0 : index
    %5 = vector.load %arg4[%c0_4, %c0_5] : memref<8x1xf32, #tpu.memory_space<vmem>>, vector<8x1xf32>
    %6 = math.absf %3 : vector<8x256xf32>
    %cst = arith.constant 0.000000e+00 : f32
    %7 = vector.broadcast %cst : f32 to vector<8x256xf32>
    %8 = arith.subf %7, %6 : vector<8x256xf32>
    %9 = math.exp %8 : vector<8x256xf32>
    %10 = math.log1p %9 : vector<8x256xf32>
    %cst_6 = arith.constant 0.000000e+00 : f32
    %11 = vector.broadcast %cst_6 : f32 to vector<8x256xf32>
    %12 = arith.subf %11, %3 : vector<8x256xf32>
    %cst_7 = arith.constant 0.000000e+00 : f32
    %13 = vector.broadcast %cst_7 : f32 to vector<8x256xf32>
    %14 = arith.maximumf %12, %13 : vector<8x256xf32>
    %15 = arith.addf %10, %14 : vector<8x256xf32>
    %cst_8 = arith.constant 1.000000e+00 : f32
    %16 = vector.broadcast %cst_8 : f32 to vector<8x256xf32>
    %17 = arith.subf %16, %4 : vector<8x256xf32>
    %18 = arith.mulf %17, %3 : vector<8x256xf32>
    %cst_9 = arith.constant 1.000000e+00 : f32
    %19 = vector.broadcast %cst_9 : f32 to vector<8x1xf32>
    %20 = arith.subf %5, %19 : vector<8x1xf32>
    %21 = vector.broadcast %20 : vector<8x1xf32> to vector<8x256xf32>
    %22 = arith.mulf %21, %4 : vector<8x256xf32>
    %cst_10 = arith.constant 1.000000e+00 : f32
    %23 = vector.broadcast %cst_10 : f32 to vector<8x256xf32>
    %24 = arith.addf %23, %22 : vector<8x256xf32>
    %25 = arith.mulf %24, %15 : vector<8x256xf32>
    %26 = arith.addf %18, %25 : vector<8x256xf32>
    %cst_11 = arith.constant 0.000000e+00 : f32
    %27 = vector.broadcast %cst_11 : f32 to vector<8x256xf32>
    %28 = arith.subf %27, %26 : vector<8x256xf32>
    %29 = math.exp %28 : vector<8x256xf32>
    %cst_12 = arith.constant 1.000000e+00 : f32
    %30 = vector.broadcast %cst_12 : f32 to vector<8x256xf32>
    %31 = arith.subf %30, %29 : vector<8x256xf32>
    %cst_13 = arith.constant 1.000000e+00 : f32
    %32 = vector.broadcast %cst_13 : f32 to vector<8x256xf32>
    %33 = arith.mulf %32, %31 : vector<8x256xf32>
    %34 = arith.mulf %33, %31 : vector<8x256xf32>
    %cst_14 = arith.constant 0.000000e+00 : f32
    %35 = vector.broadcast %cst_14 : f32 to vector<8x256xf32>
    %36 = arith.subf %35, %34 : vector<8x256xf32>
    %37 = arith.mulf %36, %28 : vector<8x256xf32>
    %c0_15 = arith.constant 0 : index
    %c0_16 = arith.constant 0 : index
    %38 = vector.load %arg6[%c0_15, %c0_16] : memref<8x256xf32, #tpu.memory_space<vmem>>, vector<8x256xf32>
    %39 = arith.addf %38, %37 : vector<8x256xf32>
    %c0_17 = arith.constant 0 : index
    %c0_18 = arith.constant 0 : index
    %40 = vector.load %arg6[%c0_17, %c0_18] : memref<8x256xf32, #tpu.memory_space<vmem>>, vector<8x256xf32>
    tpu.vector_store %arg6[%c0_17, %c0_18], %39 {strides = array<i32>} : memref<8x256xf32, #tpu.memory_space<vmem>>, vector<8x256xf32>,
    %c0_i32_19 = arith.constant 0 : i32
    %41 = arith.cmpi eq, %arg1, %c0_i32_19 : i32
    %42 = arith.extui %41 : i1 to i32
    %c0_i32_20 = arith.constant 0 : i32
    %43 = arith.cmpi ne, %42, %c0_i32_20 : i32
    scf.if %43 {
      %c0_21 = arith.constant 0 : index
      %c0_22 = arith.constant 0 : index
      %44 = vector.load %arg6[%c0_21, %c0_22] : memref<8x256xf32, #tpu.memory_space<vmem>>, vector<8x256xf32>
      %45 = vector.extract_strided_slice %44 {offsets = [0, 0], sizes = [8, 128], strides = [1, 1]} : vector<8x256xf32> to vector<8x128xf32>
      %46 = vector.extract_strided_slice %44 {offsets = [0, 128], sizes = [8, 128], strides = [1, 1]} : vector<8x256xf32> to vector<8x128xf32>
      %47 = arith.addf %45, %46 : vector<8x128xf32>
      %c0_23 = arith.constant 0 : index
      %c0_24 = arith.constant 0 : index
      %48 = vector.load %arg5[%c0_23, %c0_24] : memref<8x128xf32, #tpu.memory_space<vmem>>, vector<8x128xf32>
      tpu.vector_store %arg5[%c0_23, %c0_24], %47 {strides = array<i32>} : memref<8x128xf32, #tpu.memory_space<vmem>>, vector<8x128xf32>,
    } else {
    }
    return
  }
  func.func @transform_0(%arg0: i32, %arg1: i32) -> (i32, i32) {
    %c0_i32 = arith.constant 0 : i32
    return %arg0, %arg1 : i32, i32
  }
  func.func @transform_1(%arg0: i32, %arg1: i32) -> (i32, i32) {
    %c0_i32 = arith.constant 0 : i32
    return %arg0, %arg1 : i32, i32
  }
  func.func @transform_2(%arg0: i32, %arg1: i32) -> (i32, i32) {
    %c0_i32 = arith.constant 0 : i32
    %c0_i32_0 = arith.constant 0 : i32
    return %arg0, %c0_i32 : i32, i32
  }
  func.func @transform_3(%arg0: i32, %arg1: i32) -> (i32, i32) {
    %c0_i32 = arith.constant 0 : i32
    %c0_i32_0 = arith.constant 0 : i32
    return %arg0, %c0_i32 : i32, i32
  }
}

</mosaic_0001>

<bundles_post_ra>
// kernel: tpu_custom_call.1
= control target key start
LH: loop header
LB: loop body
LE: loop exit
PB: predicated region body
PF: predicated region fallthrough
CT: control target
= control target key end

     0   :  { %8 = vsyncpa [#allocation4], 0  ;;  %s296_s0 = inlined_call_operand.hbm [shape: f32[8,256], index: 0, kind: input, shape index: {}]   ;;  %s297_s1 = inlined_call_operand.hbm [shape: f32[8,256], index: 1, kind: input, shape index: {}]   ;;  %s298_s2 = inlined_call_operand.vmem [shape: f32[8,1], index: 2, kind: input, shape index: {}]   ;;  %s299_s3 = inlined_call_operand.hbm [shape: f32[8,128], index: 3, kind: output, shape index: {}]  }
   0x1   :  { %9 = vsyncpa [#allocation7], 0 }
   0x2   :  { %10 = vsyncpa [#allocation5], 0  ;;  %s233_s12 = smov [#allocation3]   ;;  %s234_s14 = smov [#allocation6]  }
   0x3   :  { %s17_s13 = sshll.u32 %s233_s12, 4  ;;  %s27_s15 = sshll.u32 %s234_s14, 4  ;;  %s18_s13 = int_to_ptr.vmem [resolvable:$true] %s17_s13  ;;  %s28_s15 = int_to_ptr.vmem [resolvable:$true] %s27_s15 }
   0x4   :  { %s161_s18 = scalar_lea.hbm %s296_s0, 256 }
   0x5   :  { %p162_p0 = scmp.ne.s32.totalorder %s296_s0, %s161_s18  ;;  %p165_p1 = scmp.lt.u32.totalorder %s161_s18, %s296_s0 }
   0x7   :  { %p167_p2 = pnand %p165_p1, %p162_p0 }
   0x9   :  { %170 = shalt.err (!%p167_p2)
}
   0xa   :  { %s171_s23 = scalar_lea.vmem %s18_s13, 256  ;;  %p176_p4 = scmp.lt.s32.totalorder %s18_s13, %s18_s13 }
   0xb   :  { %p172_p3 = scmp.ne.s32.totalorder %s18_s13, %s171_s23  ;;  %p177_p5 = scmp.lt.s32.totalorder %s171_s23, %s171_s23 }
   0xd   :  { %p178_p6 = por %p177_p5, %p176_p4 }
   0xf   :  { %p179_p7 = pnand %p178_p6, %p172_p3 }
  0x11   :  { %182 = shalt.err (!%p179_p7)
}
  0x12   :  { %20 = dma.hbm_to_vmem [thread:$0]  %s296_s0, 256, %s18_s13, [#allocation4]  }
  0x13   :  { %s183_s28 = scalar_lea.hbm %s297_s1, 256 }
  0x14   :  { %p184_p8 = scmp.ne.s32.totalorder %s297_s1, %s183_s28  ;;  %p187_p9 = scmp.lt.u32.totalorder %s183_s28, %s297_s1 }
  0x16   :  { %p189_p10 = pnand %p187_p9, %p184_p8 }
  0x18   :  { %192 = shalt.err (!%p189_p10)
}
  0x19   :  { %s193_s6 = scalar_lea.vmem %s28_s15, 256  ;;  %p198_p12 = scmp.lt.s32.totalorder %s28_s15, %s28_s15 }
  0x1a   :  { %p194_p11 = scmp.ne.s32.totalorder %s28_s15, %s193_s6  ;;  %p199_p13 = scmp.lt.s32.totalorder %s193_s6, %s193_s6 }
  0x1c   :  { %p200_p0 = por %p199_p13, %p198_p12 }
  0x1e   :  { %p201_p1 = pnand %p200_p0, %p194_p11 }
  0x20   :  { %204 = shalt.err (!%p201_p1)
}
  0x21   :  { %30 = dma.hbm_to_vmem [thread:$0]  %s297_s1, 256, %s28_s15, [#allocation7]  }
  0x22   :  { %227 = dma.done.wait [#allocation4], 256  }
  0x23   :  { %228 = vsyncadd [#allocation4], 4294967040 }
  0x24   :  { %229 = dma.done.wait [#allocation7], 256  }
  0x25   :  { %230 = vsyncadd [#allocation7], 4294967040  ;;  %v235_v0 = vmov 0   ;;  %v49_v1 = vld [vmem:[%s298_s2] sm:$0xff]  ;;  %v46_v4 = vld [vmem:[#allocation3 + $0x8] sm:$0xff]  ;;  %s236_s1 = smov [#allocation8]  }
  0x26   :  { %148 = vset.pattern.permute.xlu0 %v235_v0  ;;  %v143_v2 = vadd.f32 -1.0, %v49_v1  ;;  %v45_v3 = vld [vmem:[#allocation3] sm:$0xff]  ;;  %v51_v6 = vand.u32 2147483647, %v46_v4  ;;  %v77_v24 = vsub.f32 0.0, %v46_v4  ;;  %v47_v31 = vld [vmem:[#allocation6] sm:$0xff] }
  0x27   :  { %v50_v5 = vand.u32 2147483647, %v45_v3  ;;  %v76_v23 = vsub.f32 0.0, %v45_v3  ;;  %v48_v32 = vld [vmem:[#allocation6 + $0x8] sm:$0xff]  ;;  %v82_v35 = vsub.f32 1.0, %v47_v31  ;;  %s133_s2 = sshll.u32 %s236_s1, 4  ;;  %s134_s2 = int_to_ptr.vmem [resolvable:$true] %s133_s2 }
  0x28   :  { %89 = vperm.xlu0 %148, %v143_v2   ;;  %v53_v8 = vsub.f32 0.0, %v51_v6  ;;  %v79_v30 = vmax.f32 %v77_v24, 0.0  ;;  %v83_v36 = vsub.f32 1.0, %v48_v32  ;;  %s205_s10 = scalar_lea.vmem %s134_s2, 128  ;;  %p210_p3 = scmp.lt.s32.totalorder %s134_s2, %s134_s2 }
  0x29   :  { %v52_v7 = vsub.f32 0.0, %v50_v5  ;;  %v78_v29 = vmax.f32 %v76_v23, 0.0  ;;  %v84_v42 = vmul.f32 %v82_v35, %v45_v3  ;;  %p206_p2 = scmp.ne.s32.totalorder %s134_s2, %s205_s10  ;;  %p211_p4 = scmp.lt.s32.totalorder %s205_s10, %s205_s10 }
  0x2a   :  { %v56_v10 = vmul.f32 1.442695, %v53_v8  ;;  %v85_v43 = vmul.f32 %v83_v36, %v46_v4 }
  0x2b   :  { %v54_v9 = vmul.f32 1.442695, %v52_v7  ;;  %p212_p5 = por %p211_p4, %p210_p3 }
  0x2d   :  { %149 = vpow2.f32 %v54_v9  ;;  %p213_p6 = pnand %p212_p5, %p206_p2 }
  0x2e   :  { %151 = vpow2.f32 %v56_v10 }
  0x37   :  { %v150_v11 = vpop.eup %149 }
  0x38   :  { %v152_v12 = vpop.eup %151  ;;  %v58_v13 = vadd.f32 1.0, %v150_v11  ;;  %v61_v15 = vmul.f32 -0.5, %v150_v11  ;;  %v64_v21 = vand.u32 2147483647, %v150_v11 }
  0x39   :  { %v67_v14 = vadd.f32 1.0, %v152_v12  ;;  %v70_v16 = vmul.f32 -0.5, %v152_v12  ;;  %v73_v22 = vand.u32 2147483647, %v152_v12 }
  0x3a   :  { %153 = vlog2.f32 %v58_v13  ;;  %v62_v18 = vadd.f32 1.0, %v61_v15  ;;  %vm65_vm0 = vcmp.lt.f32.partialorder %v64_v21, 0.0004427343 }
  0x3b   :  { %155 = vlog2.f32 %v67_v14  ;;  %v71_v19 = vadd.f32 1.0, %v70_v16  ;;  %vm74_vm1 = vcmp.lt.f32.partialorder %v73_v22, 0.0004427343 }
  0x3c   :  { %v63_v26 = vmul.f32 %v150_v11, %v62_v18 }
  0x3d   :  { %v72_v28 = vmul.f32 %v152_v12, %v71_v19 }
  0x44   :  { %v154_v17 = vpop.eup %153 }
  0x45   :  { %v156_v20 = vpop.eup %155  ;;  %v60_v25 = vmul.f32 0.6931472, %v154_v17 }
  0x46   :  { %v69_v27 = vmul.f32 0.6931472, %v156_v20 }
  0x47   :  { %v66_v33 = vsel %vm65_vm0, %v63_v26, %v60_v25 }
  0x48   :  { %v75_v34 = vsel %vm74_vm1, %v72_v28, %v69_v27  ;;  %v80_v38 = vadd.f32 %v78_v29, %v66_v33 }
  0x49   :  { %v81_v39 = vadd.f32 %v79_v30, %v75_v34 }
  0xa7   :  { %v90_v37 = vpop.permute.xlu0 %89 }
  0xa8   :  { %v92_v40 = vmul.f32 %v90_v37, %v47_v31  ;;  %v93_v41 = vmul.f32 %v90_v37, %v48_v32 }
  0xaa   :  { %v94_v44 = vadd.f32 1.0, %v92_v40  ;;  %v95_v45 = vadd.f32 1.0, %v93_v41 }
  0xac   :  { %v96_v46 = vmul.f32 %v94_v44, %v80_v38  ;;  %v97_v47 = vmul.f32 %v95_v45, %v81_v39 }
  0xae   :  { %v98_v48 = vadd.f32 %v96_v46, %v84_v42  ;;  %v99_v49 = vadd.f32 %v97_v47, %v85_v43 }
  0xb0   :  { %v100_v50 = vsub.f32 0.0, %v98_v48  ;;  %v101_v51 = vsub.f32 0.0, %v99_v49 }
  0xb2   :  { %v102_v52 = vmul.f32 1.442695, %v100_v50  ;;  %v104_v53 = vmul.f32 1.442695, %v101_v51 }
  0xb4   :  { %157 = vpow2.f32 %v102_v52 }
  0xb5   :  { %159 = vpow2.f32 %v104_v53 }
  0xbe   :  { %v158_v54 = vpop.eup %157 }
  0xbf   :  { %v160_v55 = vpop.eup %159  ;;  %v106_v56 = vsub.f32 1.0, %v158_v54 }
  0xc0   :  { %v107_v57 = vsub.f32 1.0, %v160_v55 }
  0xc1   :  { %v108_v58 = vmul.f32 %v106_v56, %v106_v56 }
  0xc2   :  { %v109_v59 = vmul.f32 %v107_v57, %v107_v57 }
  0xc3   :  { %v110_v60 = vsub.f32 0.0, %v108_v58 }
  0xc4   :  { %v111_v61 = vsub.f32 0.0, %v109_v59 }
  0xc5   :  { %v112_v62 = vmul.f32 %v110_v60, %v100_v50 }
  0xc6   :  { %v113_v63 = vmul.f32 %v111_v61, %v101_v51 }
  0xc8   :  { %v125_v0 = vadd.f32 %v113_v63, %v112_v62 }
  0xca   :  { %126 = vst [vmem:[#allocation8] sm:$0xff] %v125_v0 }
  0xcb   :  { %216 = shalt.err (!%p213_p6)
}
  0xcc   :  { %s217_s13 = scalar_lea.hbm %s299_s3, 128 }
  0xcd   :  { %p218_p7 = scmp.ne.s32.totalorder %s299_s3, %s217_s13  ;;  %p221_p8 = scmp.lt.u32.totalorder %s217_s13, %s299_s3 }
  0xcf   :  { %p223_p9 = pnand %p221_p8, %p218_p7 }
  0xd1   :  { %226 = shalt.err (!%p223_p9)
}
  0xd2   :  { %136 = dma.vmem_to_hbm [thread:$0]  %s134_s2, 128, %s299_s3, [#allocation5]  }
  0xd3   :  { %231 = dma.done.wait [#allocation5], 128  }
  0xd4   :  { %232 = vsyncadd [#allocation5], 4294967168 }
  0xd5   :  { %140 = vsyncpa [#allocation4], 1 }
  0xd6   :  { %141 = vsyncpa [#allocation7], 1 }
  0xd7   :  { %142 = vsyncpa [#allocation5], 1 }

</bundles_post_ra>
